<compile_context>
chip_gen: v6e
topology: v6e:2x2x1
jax: 0.10.0
libtpu: 0.0.40
codegen_flags: <defaults>
</compile_context>

<pallas_src>
import jax
import jax.numpy as jnp
from jax.experimental import pallas as pl
from jax.experimental.pallas import tpu as pltpu


# ---------------------------------------------------------------------------
# Pallas kernel: TB batch elements per grid step.
#   x_ref : [TB, C, HW]   input tile (lane-dense spatial axis)
#   w_ref : [C, 2C]       1x1-conv weight (avg-half | max-half), PyTorch layout
#   b_ref : [C, 1]        1x1-conv bias
#   o_ref : [TB, C, HW]   output tile
# ---------------------------------------------------------------------------
def _tiny_scene_kernel(x_ref, w_ref, b_ref, o_ref):
    f32 = jnp.float32
    x = x_ref[...]                                       # [TB, C, HW], native dtype
    TB, C, HW = x.shape

    # Global average / max pooling: lane reductions, f32 accumulation.
    avg = jnp.sum(x, axis=-1, keepdims=True, dtype=f32) * (1.0 / HW)   # [TB, C, 1]
    mx = jnp.max(x, axis=-1, keepdims=True).astype(f32)                # [TB, C, 1]

    # 1x1 conv over the concatenated pooled vector, on the VPU/XLU (no MXU):
    #   y[b, o] = sum_k w[o, k] * cat(avg, max)[b, k] + bias[o]
    # Relayout the tiny pooled columns into lane-major rows, elementwise-multiply with
    # the [C, 2C] weight, lane-reduce.  Result lands directly in [TB, C, 1] column form.
    avg_row = avg.reshape(TB, 1, C)                      # [TB, 1, C]
    mx_row = mx.reshape(TB, 1, C)                        # [TB, 1, C]
    pooled_row = jnp.concatenate([avg_row, mx_row], axis=-1)           # [TB, 1, 2C]
    w = w_ref[...].astype(f32)[None]                     # [1, C, 2C]
    y = jnp.sum(w * pooled_row, axis=-1, keepdims=True)  # [TB, C, 1]
    y = y + b_ref[...].astype(f32)[None]                 # [TB, C, 1]

    # Sigmoid gate (EUP) + residual:  out = x * (1 + sigmoid(y)).
    # Gate is cast to x's dtype so the big-tile multiply/store stay bf16 on bf16 inputs.
    gate = (1.0 + jax.nn.sigmoid(y)).astype(x.dtype)     # [TB, C, 1]
    o_ref[...] = (x * gate).astype(o_ref.dtype)          # one store per output vreg


# ---------------------------------------------------------------------------
# Wrapper: tiling heuristic + pallas_call.
# ---------------------------------------------------------------------------
def tiny_scene_embedding(x, w, b):
    """x: [B, C, H, W]; w: [C, 2C] or [C, 2C, 1, 1] (PyTorch conv weight); b: [C]."""
    B, C, H, W = x.shape
    if w.ndim == 4:
        w = w.reshape(w.shape[0], w.shape[1])
    assert w.shape == (C, 2 * C)
    HW = H * W

    x2 = x.reshape(B, C, HW)                             # lane-dense spatial axis
    b2 = b.reshape(C, 1)

    # Batches per grid step: fill 8 sublanes when C is small, but keep >= 2 grid steps
    # when B >= 2 so v7x's two TensorCores both get work ("parallel" batch axis).
    tb = min(B, max(1, 8 // max(C, 1)))
    if B >= 2:
        tb = min(tb, max(1, B // 2))
    TB = max(1, tb)
    grid = (pl.cdiv(B, TB),)

    itemsize = jnp.dtype(x.dtype).itemsize
    cost = pl.CostEstimate(
        flops=int(B * (4 * C * HW + 4 * C * C + 4 * C)),
        transcendentals=int(B * C),
        bytes_accessed=int(2 * B * C * HW * itemsize + (2 * C * C + C) * 4),
    )

    # VMEM budget: in + out whole-image tiles, double-buffered, plus tiny weight/bias.
    tile_bytes = TB * C * HW * itemsize
    vmem_need = 4 * tile_bytes + (2 * C * C + C) * 8
    compiler_kwargs = dict(dimension_semantics=("parallel",))  # batch is independent
    if vmem_need > (24 << 20):
        # Bump scoped VMEM, staying inside v7x's 64 MiB physical VMEM.
        compiler_kwargs["vmem_limit_bytes"] = int(min(vmem_need + (4 << 20), 48 << 20))

    out = pl.pallas_call(
        _tiny_scene_kernel,
        out_shape=jax.ShapeDtypeStruct((B, C, HW), x.dtype),
        grid=grid,
        in_specs=[
            pl.BlockSpec((TB, C, HW), lambda i: (i, 0, 0)),
            pl.BlockSpec((C, 2 * C), lambda i: (0, 0)),   # constant index -> fetched once
            pl.BlockSpec((C, 1), lambda i: (0, 0)),       # constant index -> fetched once
        ],
        out_specs=pl.BlockSpec((TB, C, HW), lambda i: (i, 0, 0)),
        compiler_params=pltpu.CompilerParams(**compiler_kwargs),
        cost_estimate=cost,
    )(x2, w, b2)
    return out.reshape(B, C, H, W)


# ---------------------------------------------------------------------------
# Pure-JAX reference (mirrors the PyTorch forward exactly).
# ---------------------------------------------------------------------------
def ref_tiny_scene_embedding(x, w, b):
    B, C, H, W = x.shape
    if w.ndim == 4:
        w = w.reshape(w.shape[0], w.shape[1])
    avg = jnp.mean(x, axis=(2, 3))                                   # [B, C]
    mx = jnp.max(x, axis=(2, 3))                                     # [B, C]
    cat = jnp.concatenate([avg, mx], axis=1)                         # [B, 2C]
    y = jnp.sum(w[None, :, :] * cat[:, None, :], axis=-1) + b[None]  # [B, C]
    s = jax.nn.sigmoid(y)[:, :, None, None]                          # [B, C, 1, 1]
    return x + x * s


if __name__ == "__main__":
    B, C, H, W = 2, 4, 16, 16

    key = jax.random.PRNGKey(0)
    kx, kw, kb = jax.random.split(key, 3)
    x = jax.random.normal(kx, (B, C, H, W), jnp.float32)
    w = jax.random.normal(kw, (C, 2 * C), jnp.float32) * 0.3   # conv.weight [C, 2C, 1, 1]
    b = jax.random.normal(kb, (C,), jnp.float32) * 0.1         # conv.bias   [C]

    out = tiny_scene_embedding(x, w, b)
    out = jax.block_until_ready(out)

    ref = ref_tiny_scene_embedding(x, w, b)
    ref = jax.block_until_ready(ref)

    assert out.shape == (B, C, H, W)
    assert bool(jnp.all(jnp.isfinite(out)))
    assert bool(jnp.allclose(out, ref, atol=1e-4, rtol=1e-4))
    print("KERNEL_OK")
</pallas_src>

<mosaic_0001>
module attributes {stable_mosaic.version = 11 : i64} {
  func.func @_tiny_scene_kernel(%arg0: i32, %arg1: memref<1x4x256xf32, #tpu.memory_space<vmem>>, %arg2: memref<4x8xf32, #tpu.memory_space<vmem>>, %arg3: memref<4x1xf32, #tpu.memory_space<vmem>>, %arg4: memref<1x4x256xf32, #tpu.memory_space<vmem>>) attributes {dimension_semantics = [#tpu.dimension_semantics<parallel>], iteration_bounds = array<i64: 2>, scalar_prefetch = 0 : i64, scratch_operands = 0 : i64, tpu.core_type = #tpu.core_type<tc>, window_params = [{transform_indices = @transform_0, window_bounds = array<i64: 1, 4, 256>}, {pipeline_mode = #tpu.pipeline_mode<synchronous>, transform_indices = @transform_1, window_bounds = array<i64: 4, 8>}, {pipeline_mode = #tpu.pipeline_mode<synchronous>, transform_indices = @transform_2, window_bounds = array<i64: 4, 1>}, {transform_indices = @transform_3, window_bounds = array<i64: 1, 4, 256>}]} {
    %c0 = arith.constant 0 : index
    %c0_0 = arith.constant 0 : index
    %c0_1 = arith.constant 0 : index
    %0 = vector.load %arg1[%c0, %c0_0, %c0_1] : memref<1x4x256xf32, #tpu.memory_space<vmem>>, vector<1x4x256xf32>
    %cst = arith.constant dense<0.000000e+00> : vector<1x4xf32>
    %1 = vector.multi_reduction <add>, %0, %cst [2] : vector<1x4x256xf32> to vector<1x4xf32>
    %2 = vector.shape_cast %1 : vector<1x4xf32> to vector<1x4x1xf32>
    %cst_2 = arith.constant 3.906250e-03 : f32
    %3 = vector.broadcast %cst_2 : f32 to vector<1x4x1xf32>
    %4 = arith.mulf %2, %3 : vector<1x4x1xf32>
    %cst_3 = arith.constant dense<0xFF800000> : vector<1x4xf32>
    %5 = vector.multi_reduction <maximumf>, %0, %cst_3 [2] : vector<1x4x256xf32> to vector<1x4xf32>
    %6 = vector.shape_cast %5 : vector<1x4xf32> to vector<1x4x1xf32>
    %7 = vector.shape_cast %4 : vector<1x4x1xf32> to vector<1x1x4xf32>
    %8 = vector.shape_cast %6 : vector<1x4x1xf32> to vector<1x1x4xf32>
    %9 = tpu.concatenate %7, %8 in 2 : vector<1x1x4xf32>, vector<1x1x4xf32> -> vector<1x1x8xf32>
    %c0_4 = arith.constant 0 : index
    %c0_5 = arith.constant 0 : index
    %10 = vector.load %arg2[%c0_4, %c0_5] : memref<4x8xf32, #tpu.memory_space<vmem>>, vector<4x8xf32>
    %11 = vector.shape_cast %10 : vector<4x8xf32> to vector<1x4x8xf32>
    %12 = vector.broadcast %9 : vector<1x1x8xf32> to vector<1x4x8xf32>
    %13 = arith.mulf %11, %12 : vector<1x4x8xf32>
    %cst_6 = arith.constant dense<0.000000e+00> : vector<1x4xf32>
    %14 = vector.multi_reduction <add>, %13, %cst_6 [2] : vector<1x4x8xf32> to vector<1x4xf32>
    %15 = vector.shape_cast %14 : vector<1x4xf32> to vector<1x4x1xf32>
    %c0_7 = arith.constant 0 : index
    %c0_8 = arith.constant 0 : index
    %16 = vector.load %arg3[%c0_7, %c0_8] : memref<4x1xf32, #tpu.memory_space<vmem>>, vector<4x1xf32>
    %17 = vector.shape_cast %16 : vector<4x1xf32> to vector<1x4x1xf32>
    %18 = arith.addf %15, %17 : vector<1x4x1xf32>
    %19 = arith.negf %18 : vector<1x4x1xf32>
    %20 = math.exp %19 : vector<1x4x1xf32>
    %cst_9 = arith.constant 1.000000e+00 : f32
    %21 = vector.broadcast %cst_9 : f32 to vector<1x4x1xf32>
    %22 = arith.addf %21, %20 : vector<1x4x1xf32>
    %23 = arith.divf %21, %22 : vector<1x4x1xf32>
    %cst_10 = arith.constant 1.000000e+00 : f32
    %24 = vector.broadcast %cst_10 : f32 to vector<1x4x1xf32>
    %25 = arith.addf %24, %23 : vector<1x4x1xf32>
    %26 = vector.broadcast %25 : vector<1x4x1xf32> to vector<1x4x256xf32>
    %27 = arith.mulf %0, %26 : vector<1x4x256xf32>
    %c0_11 = arith.constant 0 : index
    %c0_12 = arith.constant 0 : index
    %c0_13 = arith.constant 0 : index
    %28 = vector.load %arg4[%c0_11, %c0_12, %c0_13] : memref<1x4x256xf32, #tpu.memory_space<vmem>>, vector<1x4x256xf32>
    tpu.vector_store %arg4[%c0_11, %c0_12, %c0_13], %27 {strides = array<i32>} : memref<1x4x256xf32, #tpu.memory_space<vmem>>, vector<1x4x256xf32>,
    return
  }
  func.func @transform_0(%arg0: i32) -> (i32, i32, i32) {
    %c0_i32 = arith.constant 0 : i32
    %c0_i32_0 = arith.constant 0 : i32
    %c0_i32_1 = arith.constant 0 : i32
    return %arg0, %c0_i32, %c0_i32_0 : i32, i32, i32
  }
  func.func @transform_1(%arg0: i32) -> (i32, i32) {
    %c0_i32 = arith.constant 0 : i32
    %c0_i32_0 = arith.constant 0 : i32
    %c0_i32_1 = arith.constant 0 : i32
    return %c0_i32, %c0_i32_0 : i32, i32
  }
  func.func @transform_2(%arg0: i32) -> (i32, i32) {
    %c0_i32 = arith.constant 0 : i32
    %c0_i32_0 = arith.constant 0 : i32
    %c0_i32_1 = arith.constant 0 : i32
    return %c0_i32, %c0_i32_0 : i32, i32
  }
  func.func @transform_3(%arg0: i32) -> (i32, i32, i32) {
    %c0_i32 = arith.constant 0 : i32
    %c0_i32_0 = arith.constant 0 : i32
    %c0_i32_1 = arith.constant 0 : i32
    return %arg0, %c0_i32, %c0_i32_0 : i32, i32, i32
  }
}

</mosaic_0001>

<bundles_post_ra>
// kernel: tpu_custom_call.1
= control target key start
LH: loop header
LB: loop body
LE: loop exit
PB: predicated region body
PF: predicated region fallthrough
CT: control target
= control target key end

     0   :  { %8 = vsyncpa [#allocation3], 0  ;;  %s679_s0 = inlined_call_operand.hbm [shape: f32[2,4,256], index: 0, kind: input, shape index: {}]   ;;  %s680_s1 = inlined_call_operand.vmem [shape: f32[4,8], index: 1, kind: input, shape index: {}]   ;;  %s681_s2 = inlined_call_operand.vmem [shape: f32[4,1], index: 2, kind: input, shape index: {}]   ;;  %s682_s3 = inlined_call_operand.hbm [shape: f32[2,4,256], index: 3, kind: output, shape index: {}]  }
   0x1   :  { %10 = vsyncpa [#allocation3 + $0x1], 0 }
   0x2   :  { %11 = vsyncpa [#allocation4], 0 }
   0x3   :  { %13 = vsyncpa [#allocation4 + $0x1], 0  ;;  %s528_s12 = smov 0   ;;  %s530_s13 = smov 0  }
   0x4   :  { %s532_s14 = smov 0   ;;  %s534_s15 = smov 0  }
   0x5 LB: > { %s549_s16 = sadd.s32 4294967295, %s502_s15   ;;  %s338_s17 = sadd.s32 4294967294, %s502_s15   ;;  %s502_s15 = sphi %s534_s15, %s699_s15   ;;  %s498_s14 = sphi %s532_s14, %s698_s14   ;;  %s494_s13 = sphi %s530_s13, %s697_s13   ;;  %s490_s12 = sphi %s528_s12, %s696_s12  }
   0x6   : > { %s553_s18 = sadd.s32 1, %s502_s15   ;;  %s26_s19 = sadd.s32 1, %s498_s14 }
   0x7   : > { %s23_s20 = ssub.s32 %s502_s15, %s553_s18  ;;  %p33_p0 = scmp.ne.s32.totalorder %s498_s14, %s494_s13 }
   0x8   : > { %p24_p1 = scmp.eq.s32.totalorder %s23_s20, 0  ;;  %p34_p2 = scmp.eq.s32.totalorder %s502_s15, 0 }
   0x9   : > { %p39_p3 = scmp.ne.s32.totalorder %s494_s13, %s490_s12  ;;  %p40_p4 = scmp.eq.s32.totalorder %s549_s16, 0 }
   0xa   : > { %s565_s21 = scalar_select %p24_p1, %s498_s14, %s26_s19  }
   0xb   : > { %p567_p5 = por %p34_p2, %p33_p0  ;;  %p571_p6 = por %p40_p4, %p39_p3 }
   0xc   : > { %p105_p7 = scmp.eq.s32.totalorder %s549_s16, 1  ;;  %p111_p8 = scmp.eq.s32.totalorder %s338_s17, 1 }
   0xd   : > { %s686_s23 = scalar_select %p571_p6, 1, 0 }
   0xe   : > { %p367_p10 = scmp.lt.s32.totalorder %s502_s15, 2  ;;  %p578_p11 = por %p105_p7, %p33_p0 }
   0xf   : > { %p582_p12 = por %p111_p8, %p39_p3  ;;  %s137_s26 = sand.u32 1, %s498_s14  }
  0x10   : > { %s687_s24 = scalar_select %p578_p11, 1, 0 }
  0x11   : > { %s688_s25 = scalar_select %p582_p12, 1, 0 }
  0x12   : > { %s353_s27 = sshll.u32 %s502_s15, 7  ;;  %s341_s28 = sshll.u32 %s137_s26, 3 }
  0x13   : > { %s591_s4 = scalar_lea.hbm %s679_s0, %s353_s27  ;;  %s141_s5 = scalar_lea.vmem [#allocation2], %s341_s28 }
  0x14   : > { %s149_s6 = sshll.u32 %s141_s5, 4  ;;  %p595_p13 = pnand %p367_p10, %p567_p5  ;;  %s599_s6 = int_to_ptr.vmem [resolvable:$true] %s149_s6 }
  0x15   : > { %s138_s8 = scalar_lea.sflag [#allocation3], %s137_s26  ;;  %s410_s9 = scalar_lea.hbm %s591_s4, 128 }
  0x16   : > { %p411_p2 = scmp.ne.s32.totalorder %s591_s4, %s410_s9  ;;  %p412_p3 = pneg %p595_p13 }
  0x17   : > { %s415_s17 = scalar_lea.hbm %s679_s0, 256  ;;  %p416_p5 = scmp.lt.s32.totalorder %s591_s4, %s679_s0 }
  0x18   : > { %p413_p4 = pnand %p412_p3, %p411_p2  ;;  %p417_p8 = scmp.lt.s32.totalorder %s415_s17, %s410_s9 }
  0x1a   : > { %p414_p7 = pneg %p413_p4  ;;  %p418_p10 = por %p417_p8, %p416_p5 }
  0x1c   : > { %p419_p9 = pnand %p418_p10, %p414_p7 }
  0x1e   : > { %422 = shalt.err (!%p419_p9)
}
  0x1f   : > { %s423_s22 = scalar_lea.vmem %s599_s6, 128  ;;  %s504_s26 = smov [#allocation2]  }
  0x20   : > { %p424_p0 = scmp.ne.s32.totalorder %s599_s6, %s423_s22  ;;  %s428_s27 = sshll.u32 %s504_s26, 4  ;;  %s429_s27 = int_to_ptr.vmem [resolvable:$false] %s428_s27 }
  0x21   : > { %s430_s28 = scalar_lea.vmem %s429_s27, 256  ;;  %p431_p4 = scmp.lt.s32.totalorder %s599_s6, %s429_s27 }
  0x22   : > { %p426_p1 = pnand %p424_p0, %p412_p3  ;;  %p432_p12 = scmp.lt.s32.totalorder %s430_s28, %s423_s22 }
  0x24   : > { %p427_p2 = pneg %p426_p1  ;;  %p433_p11 = por %p432_p12, %p431_p4 }
  0x26   : > { %p434_p6 = pnand %p433_p11, %p427_p2 }
  0x28   : > { %437 = shalt.err (!%p434_p6)
}
  0x29   : > { %362 = dma.hbm_to_vmem [thread:$0]  (!%p595_p13), %s591_s4, 128, %s599_s6, %s138_s8  }
  0x2a   : > { %p690_p9 = scmp.lt.s32.totalorder %s502_s15, 3  ;;  %p691_p7 = scmp.ge.s32.totalorder %s502_s15, 1 }
  0x2c   : > { %p155_p0 = pnand %p691_p7, %p690_p9 }
  0x2d   : > { %s626_s29 = sand.u32 (!%p155_p0), 1, %s494_s13   ;;  %p692_p6 = scmp.ne.s32.totalorder (!%p155_p0), %s686_s23, 0 }
  0x2e   : > { %158 = sbr.rel (%p155_p0) target bundleno = 523 (0x20b), region = 32  ;;  %s345_s30 = sshll.u32 (!%p155_p0), %s626_s29, 3 }
  0x2f   : > { %s161_s5 = scalar_lea.sflag (!%p155_p0), [#allocation3], %s626_s29  ;;  %s164_s7 = scalar_lea.vmem (!%p155_p0), [#allocation2], %s345_s30 }
  0x33   : > { %481 = dma.done.wait (%p692_p6), %s161_s5, 128  }
  0x34   : > { %483 = vsyncadd (%p692_p6), %s161_s5, 4294967168  ;;  %vm191_vm0 = vcmask 1043456   ;;  %v187_v0 = vld [vmem:[%s164_s7] sm:$0xff]  ;;  %v204_v8 = vlaneseq  ;;  %vm218_vm1 = vcmask 31744   ;;  %vm226_vm2 = vcmask 60416   ;;  %s354_s9 = sshll.u32 %s549_s16, 7 }
  0x35   : > { %v189_v1 = vcombine.high %v187_v0, %v187_v0  ;;  %v192_v2 = vsel %vm191_vm0, %v187_v0, 0.0  ;;  %v198_v4 = vsel %vm191_vm0, %v187_v0, -inf  ;;  %v220_v21 = vld [vmem:[%s680_s1] sm:$0xf]  ;;  %v505_v25 = vmov 0   ;;  %s186_s10 = scalar_lea.vmem [#allocation5], %s345_s30  ;;  %s266_s20 = scalar_lea.hbm %s682_s3, %s354_s9 }
  0x36   : > { %v205_v9 = vand.u32 127, %v204_v8  ;;  %v207_v10 = vshrl.u32 %v204_v8, 7  ;;  %403 = vset.pattern.permute.xlu1 %v505_v25  ;;  %404 = vset.pattern.permute.xlu0 %v505_v25  ;;  %v230_v26 = vld [vmem:[%s681_s2] sm:$0xf]  ;;  %v506_v34 = vmov 839922192  }
  0x37   : > { %v193_v3 = vsel %vm191_vm0, %v189_v1, 0.0  ;;  %v199_v5 = vsel %vm191_vm0, %v189_v1, -inf  ;;  %v244_v35 = vunpack.c.l.s4 %v506_v34  ;;  %s268_s11 = sshll.u32 %s186_s10, 4  ;;  %s254_s22 = scalar_lea.sflag [#allocation4], %s626_s29  ;;  %s269_s11 = int_to_ptr.vmem [resolvable:$true] %s268_s11 }
  0x38   : > { %v194_v6 = vadd.f32 %v193_v3, %v192_v2  ;;  %v200_v7 = vmax.f32 %v198_v4, %v199_v5  ;;  %v212_v11 = vadd.s32 4294967292, %v205_v9  ;;  %v208_v13 = vsub.s32 %v205_v9, %v207_v10  ;;  %s438_s26 = scalar_lea.vmem %s269_s11, 128  ;;  %p693_p12 = scmp.ne.s32.totalorder %s687_s24, 0 }
  0x39   : > { %v223_v17 = vsub.s32 0, %v207_v10  ;;  %v245_v36 = vunpack.c.0.s8 %v244_v35  ;;  %p439_p11 = scmp.ne.s32.totalorder %s269_s11, %s438_s26  ;;  %s507_s27 = smov [#allocation5]  }
  0x3a   : > { %195 = vadd.xlane.f32.xlu0 %v194_v6  ;;  %v215_v15 = vsub.s32 %v212_v11, %v207_v10  ;;  %s442_s28 = sshll.u32 %s507_s27, 4  ;;  %s443_s28 = int_to_ptr.vmem [resolvable:$false] %s442_s28 }
  0x3b   : > { %v248_v37 = vsub.s32 %v245_v36, %v207_v10  ;;  %p440_p13 = pnand %p439_p11, %p693_p12  ;;  %s444_s16 = scalar_lea.vmem %s443_s28, 256 }
  0x3c   : > { %p445_p3 = scmp.lt.s32.totalorder %s269_s11, %s443_s28  ;;  %p446_p5 = scmp.lt.s32.totalorder %s444_s16, %s438_s26 }
  0x3d   : > { %p441_p1 = pneg %p440_p13 }
  0x3e   : > { %201 = vmax.xlane.f32.xlu0 %v200_v7  ;;  %p447_p8 = por %p446_p5, %p445_p3 }
  0x40   : > { %p448_p10 = pnand %p447_p8, %p441_p1 }
  0xc3   : > { %v196_v12 = vpop.xlane.xlu0 %195 }
  0xc4   : > { %v197_v14 = vmul.f32 0.00390625, %v196_v12 }
  0xc6   : > { %v209_v18 = vrot.slane %v197_v14, %v208_v13 }
  0xc7   : > { %v202_v16 = vpop.xlane.xlu0 %201 }
  0xc8   : > { %v216_v19 = vrot.slane %v202_v16, %v215_v15 }
  0xca   : > { %v219_v20 = vsel %vm218_vm1, %v209_v18, %v216_v19 }
  0xcb   : > { %v224_v22 = vrot.slane %v219_v20, %v223_v17 }
  0xcd   : > { %v225_v23 = vmul.f32 %v224_v22, %v220_v21 }
  0xcf   : > { %v227_v24 = vsel %vm226_vm2, %v225_v23, 0.0 }
  0xd0   : > { %228 = vadd.xlane.f32.xlu1 %v227_v24 }
 0x159   : > { %v229_v27 = vpop.xlane.xlu1 %228 }
 0x15a   : > { %v231_v28 = vadd.f32 %v230_v26, %v229_v27 }
 0x15c   : > { %v347_v29 = vmul.f32 -1.442695, %v231_v28 }
 0x15e   : > { %406 = vpow2.f32 %v347_v29 }
 0x16b   : > { %v407_v30 = vpop.eup %406 }
 0x16c   : > { %v235_v31 = vadd.f32 1.0, %v407_v30 }
 0x16e   : > { %408 = vrcp.f32 %v235_v31 }
 0x17b   : > { %v409_v32 = vpop.eup %408 }
 0x17c   : > { %v238_v33 = vadd.f32 1.0, %v409_v32 }
 0x17e   : > { %241 = vperm.xlu1 %403, %v238_v33  }
 0x1f9   : > { %v242_v38 = vpop.permute.xlu1 %241 }
 0x1fa   : > { %v249_v39 = vrot.slane %v242_v38, %v248_v37 }
 0x1fc   : > { %v251_v40 = vmul.f32 %v249_v39, %v187_v0 }
 0x1fe   : > { %252 = vst [vmem:[%s186_s10] sm:$0xff] %v251_v40 }
 0x1ff   : > { %451 = shalt.err (!%p448_p10)
}
 0x200   : > { %s452_s30 = scalar_lea.hbm %s266_s20, 128  ;;  %s456_s7 = scalar_lea.hbm %s682_s3, 256 }
 0x201   : > { %p453_p2 = scmp.ne.s32.totalorder %s266_s20, %s452_s30  ;;  %p457_p7 = scmp.lt.s32.totalorder %s266_s20, %s682_s3 }
 0x202   : > { %p458_p0 = scmp.lt.s32.totalorder %s456_s7, %s452_s30 }
 0x203   : > { %p454_p4 = pnand %p453_p2, %p693_p12 }
 0x204   : > { %p459_p6 = por %p458_p0, %p457_p7 }
 0x205   : > { %p455_p9 = pneg %p454_p4 }
 0x207   : > { %p460_p11 = pnand %p459_p6, %p455_p9 }
 0x209   : > { %463 = shalt.err (!%p460_p11)
}
 0x20a   : > { %357 = dma.vmem_to_hbm [thread:$0]  (%p693_p12), %s269_s11, 128, %s266_s20, %s254_s22  }
 0x20b PF: > { %s280_s6 = sand.u32 1, %s490_s12   ;;  %p694_p13 = scmp.ne.s32.totalorder %s688_s25, 0 }
 0x20c   : > { %p695_p1 = scmp.ge.s32.totalorder %s502_s15, 2  ;;  %s281_s8 = scalar_lea.sflag [#allocation4], %s280_s6 }
 0x20e   : > { %p364_p3 = pnand %p695_p1, %p694_p13 }
 0x210   : > { %p365_p5 = pneg %p364_p3 }
 0x212   : > { %485 = dma.done.wait (%p365_p5), %s281_s8, 128  }
 0x213   : > { %487 = vsyncadd (%p365_p5), %s281_s8, 4294967168  ;;  %p16_p8 = scmp.ge.s32.totalorder %s553_s18, 4   ;;  %s696_s12 = smov %s494_s13 }
 0x214   : > { %s697_s13 = smov %s498_s14  ;;  %s698_s14 = smov %s565_s21 }
 0x215   : > { %s699_s15 = smov %s553_s18  ;;  %18 = sbr.rel (!%p16_p8) target bundleno = 5 (0x5), region = 77 }
 0x21a   :  { %286 = vsyncpa [#allocation3], 1 }
 0x21b   :  { %288 = vsyncpa [#allocation3 + $0x1], 1 }
 0x21c   :  { %289 = vsyncpa [#allocation4], 1 }
 0x21d   :  { %291 = vsyncpa [#allocation4 + $0x1], 1 }

</bundles_post_ra>
